<compile_context>
chip_gen: v5e
topology: v5e:2x2
jax: 0.10.0
libtpu: 0.0.40
codegen_flags: <defaults>
</compile_context>

<pallas_src>
import jax
import jax.numpy as jnp
from jax.experimental import pallas as pl
from jax.experimental.pallas import tpu as pltpu

LANES = 128
SUBLANES = 8
NACC = 4  # [sum(bce), sum(valid*p), sum(pos*p), count(pos)]


def _round_up(a, m):
    return ((a + m - 1) // m) * m


def _fold_to_sublanes(v):
    """(T, 128) f32 -> (8, 128) partial sums: pure VPU vreg adds (no cross-lane XLU work)."""
    t, lanes = v.shape
    return jnp.sum(v.reshape(t // SUBLANES, SUBLANES, lanes), axis=0)


def _auch_partials_kernel(x_ref, y_ref, out_ref, acc_ref):
    # x_ref:   (T, 128) logits (column 0 of `output`), model dtype, padded with 0.
    # y_ref:   (T, 128) int8 labels in {0,1}, padding sentinel -1.
    # out_ref: (NACC, 8, 128) f32 per-part vector partial sums.
    # acc_ref: (NACC, 8, 128) f32 VMEM accumulator (persists across the reduction axis).
    b = pl.program_id(1)

    @pl.when(b == 0)
    def _init():
        acc_ref[...] = jnp.zeros_like(acc_ref)

    x = x_ref[...].astype(jnp.float32)
    y = y_ref[...].astype(jnp.float32)

    valid = (y >= 0.0).astype(jnp.float32)          # padding rows carry label -1
    pos = (y == 1.0).astype(jnp.float32)

    # Stable softplus / sigmoid: one exp + one log on the EUP; sigmoid via approx
    # reciprocal + one Newton step (VPU) instead of a second full exp.
    e = jnp.exp(-jnp.abs(x))
    sp = jnp.maximum(x, 0.0) + jnp.log(1.0 + e)     # softplus(x)
    d = 1.0 + e
    r = pl.reciprocal(d, approx=True)
    r = r * (2.0 - d * r)                           # Newton refine -> ~f32 accuracy
    p = jnp.where(x >= 0.0, r, e * r)               # sigmoid(x)

    # valid * (softplus(x) - y*x) with y in {0,1}  (valid*y == pos)
    bce = valid * sp - pos * x

    acc_ref[0] += _fold_to_sublanes(bce)
    acc_ref[1] += _fold_to_sublanes(valid * p)
    acc_ref[2] += _fold_to_sublanes(pos * p)
    acc_ref[3] += _fold_to_sublanes(pos)

    @pl.when(b == pl.num_programs(1) - 1)
    def _finalize():
        out_ref[...] = acc_ref[...]


def auch_loss(output, labels, *, tile_rows=2048):
    """output: (B, C) float logits; labels: (B, 1) (or (B,)) {0,1} labels.
    Returns (cls, 0.1 * penalty) like AUCHLoss.forward."""
    B = output.shape[0]

    # Keep the model dtype for the streamed logits (bf16 stays bf16); labels go to int8.
    x = output[:, 0]
    if x.dtype not in (jnp.dtype(jnp.float32), jnp.dtype(jnp.bfloat16)):
        x = x.astype(jnp.float32)
    y = labels.reshape(-1).astype(jnp.int8)

    rows_needed = -(-B // LANES)
    tile = min(tile_rows, _round_up(rows_needed, 32))   # mult of 32: f32/bf16/int8 tilings ok
    nb_total = -(-rows_needed // tile)
    n_parts = 2 if nb_total >= 2 else 1                 # one part per TensorCore on 2-TC chips
    nb = -(-nb_total // n_parts)
    rows = n_parts * nb * tile
    pad = rows * LANES - B

    # With allow_input_fusion these pads/reshapes fuse into the pallas_call (no extra slabs).
    x2d = jnp.pad(x, (0, pad), constant_values=0).reshape(rows, LANES)
    y2d = jnp.pad(y, (0, pad), constant_values=-1).reshape(rows, LANES)

    partials = pl.pallas_call(
        _auch_partials_kernel,
        out_shape=jax.ShapeDtypeStruct((n_parts * NACC, SUBLANES, LANES), jnp.float32),
        grid_spec=pltpu.PrefetchScalarGridSpec(
            num_scalar_prefetch=0,
            grid=(n_parts, nb),
            in_specs=[
                pl.BlockSpec((tile, LANES), lambda p, b: (p * nb + b, 0)),
                pl.BlockSpec((tile, LANES), lambda p, b: (p * nb + b, 0)),
            ],
            out_specs=pl.BlockSpec((NACC, SUBLANES, LANES), lambda p, b: (p, 0, 0)),
            scratch_shapes=[pltpu.VMEM((NACC, SUBLANES, LANES), jnp.float32)],
        ),
        compiler_params=pltpu.CompilerParams(
            dimension_semantics=("parallel", "arbitrary"),
            allow_input_fusion=[True, True]),
    )(x2d, y2d)

    # Single tiny (16 KiB) cross-lane reduction + scalar epilogue in plain XLA.
    sums = partials.reshape(n_parts, NACC, SUBLANES * LANES).sum(axis=(0, 2))
    s_bce, s_vp, s_pp, c_pos = sums[0], sums[1], sums[2], sums[3]

    Bf = jnp.float32(B)
    c_neg = Bf - c_pos
    s_neg = s_vp - s_pp                                 # sum(neg*p) = sum(valid*p) - sum(pos*p)
    bce_mean = s_bce / Bf
    mean_pos = jnp.where(c_pos > 0, s_pp / jnp.maximum(c_pos, 1.0), 0.0)
    mean_neg = jnp.where(c_neg > 0, s_neg / jnp.maximum(c_neg, 1.0), 0.0)
    penalty = 1.0 - mean_pos + mean_neg
    cls = bce_mean + 0.1 * penalty
    # TODO(synk): the host-side print('pos')/print('neg') diagnostics and the
    # try/except pdb.set_trace() debugger hook have no kernel equivalent; omitted.
    return cls, 0.1 * penalty


def auch_loss_ref(output, labels):
    """Pure-JAX reference mirroring the PyTorch forward (non-saturating regime)."""
    labels = labels.astype(jnp.float32)
    outs = jax.nn.sigmoid(output[:, :1].astype(jnp.float32))
    bce = -jnp.mean(labels * jnp.log(outs) + (1.0 - labels) * jnp.log(1.0 - outs))
    pos_m = labels == 1.0
    neg_m = labels == 0.0
    c_pos = jnp.sum(pos_m.astype(jnp.float32))
    c_neg = jnp.sum(neg_m.astype(jnp.float32))
    mean_pos = jnp.where(c_pos > 0,
                         jnp.sum(jnp.where(pos_m, outs, 0.0)) / jnp.maximum(c_pos, 1.0), 0.0)
    mean_neg = jnp.where(c_neg > 0,
                         jnp.sum(jnp.where(neg_m, outs, 0.0)) / jnp.maximum(c_neg, 1.0), 0.0)
    penalty = 1.0 - mean_pos + mean_neg
    return bce + 0.1 * penalty, 0.1 * penalty


if __name__ == "__main__":
    key = jax.random.PRNGKey(0)
    k1, k2, k3, k4 = jax.random.split(key, 4)

    loss_fn = jax.jit(auch_loss, static_argnames=("tile_rows",))

    # Small shape consistent with the module: (B, C) logits, (B, 1) {0,1} labels.
    B, C = 16, 4
    output = jax.random.normal(k1, (B, C), dtype=jnp.float32)
    labels = (jax.random.uniform(k2, (B, 1)) < 0.5).astype(jnp.float32)
    labels = labels.at[0, 0].set(1.0).at[1, 0].set(0.0)   # ensure both classes present

    cls, pen = loss_fn(output, labels)
    cls = jax.block_until_ready(cls)
    pen = jax.block_until_ready(pen)
    cls_r, pen_r = auch_loss_ref(output, labels)
    assert jnp.allclose(cls, cls_r, rtol=1e-5, atol=1e-5), (cls, cls_r)
    assert jnp.allclose(pen, pen_r, rtol=1e-5, atol=1e-5), (pen, pen_r)

    # Second check: force the multi-block / two-part path (grid (2, 2)) with a small tile.
    B2, C2 = 16384, 2
    output2 = jax.random.normal(k3, (B2, C2), dtype=jnp.float32)
    labels2 = (jax.random.uniform(k4, (B2, 1)) < 0.3).astype(jnp.float32)
    labels2 = labels2.at[0, 0].set(1.0).at[1, 0].set(0.0)

    cls2, pen2 = loss_fn(output2, labels2, tile_rows=32)
    cls2 = jax.block_until_ready(cls2)
    pen2 = jax.block_until_ready(pen2)
    cls2_r, pen2_r = auch_loss_ref(output2, labels2)
    assert jnp.allclose(cls2, cls2_r, rtol=1e-5, atol=1e-5), (cls2, cls2_r)
    assert jnp.allclose(pen2, pen2_r, rtol=1e-5, atol=1e-5), (pen2, pen2_r)

    print("KERNEL_OK")
</pallas_src>

<mosaic_0001>
module attributes {stable_mosaic.version = 11 : i64} {
  func.func @_auch_partials_kernel(%arg0: i32, %arg1: i32, %arg2: memref<32x128xf32, #tpu.memory_space<vmem>>, %arg3: memref<32x128xi8, #tpu.memory_space<vmem>>, %arg4: memref<4x8x128xf32, #tpu.memory_space<vmem>>, %arg5: memref<4x8x128xf32, #tpu.memory_space<vmem>>) attributes {dimension_semantics = [#tpu.dimension_semantics<parallel>, #tpu.dimension_semantics<arbitrary>], iteration_bounds = array<i64: 1, 1>, scalar_prefetch = 0 : i64, scratch_operands = 1 : i64, tpu.core_type = #tpu.core_type<tc>, window_params = [{transform_indices = @transform_0, window_bounds = array<i64: 32, 128>}, {transform_indices = @transform_1, window_bounds = array<i64: 32, 128>}, {transform_indices = @transform_2, window_bounds = array<i64: 4, 8, 128>}]} {
    %c0_i32 = arith.constant 0 : i32
    %0 = arith.cmpi eq, %arg1, %c0_i32 : i32
    %1 = arith.extui %0 : i1 to i32
    %c0_i32_0 = arith.constant 0 : i32
    %2 = arith.cmpi ne, %1, %c0_i32_0 : i32
    scf.if %2 {
      %cst_38 = arith.constant 0.000000e+00 : f32
      %75 = vector.broadcast %cst_38 : f32 to vector<4x8x128xf32>
      %c0_39 = arith.constant 0 : index
      %c0_40 = arith.constant 0 : index
      %c0_41 = arith.constant 0 : index
      %76 = vector.load %arg5[%c0_39, %c0_40, %c0_41] : memref<4x8x128xf32, #tpu.memory_space<vmem>>, vector<4x8x128xf32>
      tpu.vector_store %arg5[%c0_39, %c0_40, %c0_41], %75 {strides = array<i32>} : memref<4x8x128xf32, #tpu.memory_space<vmem>>, vector<4x8x128xf32>,
    } else {
    }
    %c0 = arith.constant 0 : index
    %c0_1 = arith.constant 0 : index
    %3 = vector.load %arg2[%c0, %c0_1] : memref<32x128xf32, #tpu.memory_space<vmem>>, vector<32x128xf32>
    %c0_2 = arith.constant 0 : index
    %c0_3 = arith.constant 0 : index
    %4 = vector.load %arg3[%c0_2, %c0_3] : memref<32x128xi8, #tpu.memory_space<vmem>>, vector<32x128xi8>
    %5 = arith.sitofp %4 : vector<32x128xi8> to vector<32x128xf32>
    %cst = arith.constant 0.000000e+00 : f32
    %6 = vector.broadcast %cst : f32 to vector<32x128xf32>
    %7 = arith.cmpf oge, %5, %6 : vector<32x128xf32>
    %8 = arith.extui %7 : vector<32x128xi1> to vector<32x128xi32>
    %9 = arith.sitofp %8 : vector<32x128xi32> to vector<32x128xf32>
    %cst_4 = arith.constant 1.000000e+00 : f32
    %10 = vector.broadcast %cst_4 : f32 to vector<32x128xf32>
    %11 = arith.cmpf oeq, %5, %10 : vector<32x128xf32>
    %12 = arith.extui %11 : vector<32x128xi1> to vector<32x128xi32>
    %13 = arith.sitofp %12 : vector<32x128xi32> to vector<32x128xf32>
    %14 = math.absf %3 : vector<32x128xf32>
    %cst_5 = arith.constant 0.000000e+00 : f32
    %15 = vector.broadcast %cst_5 : f32 to vector<32x128xf32>
    %16 = arith.subf %15, %14 : vector<32x128xf32>
    %17 = math.exp %16 : vector<32x128xf32>
    %cst_6 = arith.constant 0.000000e+00 : f32
    %18 = vector.broadcast %cst_6 : f32 to vector<32x128xf32>
    %19 = arith.maximumf %3, %18 : vector<32x128xf32>
    %cst_7 = arith.constant 1.000000e+00 : f32
    %20 = vector.broadcast %cst_7 : f32 to vector<32x128xf32>
    %21 = arith.addf %20, %17 : vector<32x128xf32>
    %22 = math.log %21 : vector<32x128xf32>
    %23 = arith.addf %19, %22 : vector<32x128xf32>
    %cst_8 = arith.constant 1.000000e+00 : f32
    %24 = vector.broadcast %cst_8 : f32 to vector<32x128xf32>
    %25 = arith.addf %24, %17 : vector<32x128xf32>
    %26 = tpu.reciprocal %25 {approx = true} : vector<32x128xf32> -> vector<32x128xf32>
    %27 = arith.mulf %25, %26 : vector<32x128xf32>
    %cst_9 = arith.constant 2.000000e+00 : f32
    %28 = vector.broadcast %cst_9 : f32 to vector<32x128xf32>
    %29 = arith.subf %28, %27 : vector<32x128xf32>
    %30 = arith.mulf %26, %29 : vector<32x128xf32>
    %cst_10 = arith.constant 0.000000e+00 : f32
    %31 = vector.broadcast %cst_10 : f32 to vector<32x128xf32>
    %32 = arith.cmpf oge, %3, %31 : vector<32x128xf32>
    %33 = arith.mulf %17, %30 : vector<32x128xf32>
    %34 = arith.select %32, %30, %33 : vector<32x128xi1>, vector<32x128xf32>
    %35 = arith.mulf %9, %23 : vector<32x128xf32>
    %36 = arith.mulf %13, %3 : vector<32x128xf32>
    %37 = arith.subf %35, %36 : vector<32x128xf32>
    %c0_11 = arith.constant 0 : index
    %c0_12 = arith.constant 0 : index
    %c0_13 = arith.constant 0 : index
    %38 = vector.load %arg5[%c0_11, %c0_12, %c0_13] : memref<4x8x128xf32, #tpu.memory_space<vmem>>, vector<1x8x128xf32>
    %39 = vector.shape_cast %38 : vector<1x8x128xf32> to vector<8x128xf32>
    %40 = vector.shape_cast %37 : vector<32x128xf32> to vector<4x8x128xf32>
    %cst_14 = arith.constant dense<0.000000e+00> : vector<8x128xf32>
    %41 = vector.multi_reduction <add>, %40, %cst_14 [0] : vector<4x8x128xf32> to vector<8x128xf32>
    %42 = arith.addf %39, %41 : vector<8x128xf32>
    %c0_15 = arith.constant 0 : index
    %c0_16 = arith.constant 0 : index
    %c0_17 = arith.constant 0 : index
    %43 = vector.load %arg5[%c0_15, %c0_16, %c0_17] : memref<4x8x128xf32, #tpu.memory_space<vmem>>, vector<1x8x128xf32>
    %44 = vector.shape_cast %43 : vector<1x8x128xf32> to vector<8x128xf32>
    %45 = vector.shape_cast %42 : vector<8x128xf32> to vector<1x8x128xf32>
    tpu.vector_store %arg5[%c0_15, %c0_16, %c0_17], %45 {strides = array<i32>} : memref<4x8x128xf32, #tpu.memory_space<vmem>>, vector<1x8x128xf32>,
    %c1 = arith.constant 1 : index
    %c0_18 = arith.constant 0 : index
    %c0_19 = arith.constant 0 : index
    %46 = vector.load %arg5[%c1, %c0_18, %c0_19] : memref<4x8x128xf32, #tpu.memory_space<vmem>>, vector<1x8x128xf32>
    %47 = vector.shape_cast %46 : vector<1x8x128xf32> to vector<8x128xf32>
    %48 = arith.mulf %9, %34 : vector<32x128xf32>
    %49 = vector.shape_cast %48 : vector<32x128xf32> to vector<4x8x128xf32>
    %cst_20 = arith.constant dense<0.000000e+00> : vector<8x128xf32>
    %50 = vector.multi_reduction <add>, %49, %cst_20 [0] : vector<4x8x128xf32> to vector<8x128xf32>
    %51 = arith.addf %47, %50 : vector<8x128xf32>
    %c1_21 = arith.constant 1 : index
    %c0_22 = arith.constant 0 : index
    %c0_23 = arith.constant 0 : index
    %52 = vector.load %arg5[%c1_21, %c0_22, %c0_23] : memref<4x8x128xf32, #tpu.memory_space<vmem>>, vector<1x8x128xf32>
    %53 = vector.shape_cast %52 : vector<1x8x128xf32> to vector<8x128xf32>
    %54 = vector.shape_cast %51 : vector<8x128xf32> to vector<1x8x128xf32>
    tpu.vector_store %arg5[%c1_21, %c0_22, %c0_23], %54 {strides = array<i32>} : memref<4x8x128xf32, #tpu.memory_space<vmem>>, vector<1x8x128xf32>,
    %c2 = arith.constant 2 : index
    %c0_24 = arith.constant 0 : index
    %c0_25 = arith.constant 0 : index
    %55 = vector.load %arg5[%c2, %c0_24, %c0_25] : memref<4x8x128xf32, #tpu.memory_space<vmem>>, vector<1x8x128xf32>
    %56 = vector.shape_cast %55 : vector<1x8x128xf32> to vector<8x128xf32>
    %57 = arith.mulf %13, %34 : vector<32x128xf32>
    %58 = vector.shape_cast %57 : vector<32x128xf32> to vector<4x8x128xf32>
    %cst_26 = arith.constant dense<0.000000e+00> : vector<8x128xf32>
    %59 = vector.multi_reduction <add>, %58, %cst_26 [0] : vector<4x8x128xf32> to vector<8x128xf32>
    %60 = arith.addf %56, %59 : vector<8x128xf32>
    %c2_27 = arith.constant 2 : index
    %c0_28 = arith.constant 0 : index
    %c0_29 = arith.constant 0 : index
    %61 = vector.load %arg5[%c2_27, %c0_28, %c0_29] : memref<4x8x128xf32, #tpu.memory_space<vmem>>, vector<1x8x128xf32>
    %62 = vector.shape_cast %61 : vector<1x8x128xf32> to vector<8x128xf32>
    %63 = vector.shape_cast %60 : vector<8x128xf32> to vector<1x8x128xf32>
    tpu.vector_store %arg5[%c2_27, %c0_28, %c0_29], %63 {strides = array<i32>} : memref<4x8x128xf32, #tpu.memory_space<vmem>>, vector<1x8x128xf32>,
    %c3 = arith.constant 3 : index
    %c0_30 = arith.constant 0 : index
    %c0_31 = arith.constant 0 : index
    %64 = vector.load %arg5[%c3, %c0_30, %c0_31] : memref<4x8x128xf32, #tpu.memory_space<vmem>>, vector<1x8x128xf32>
    %65 = vector.shape_cast %64 : vector<1x8x128xf32> to vector<8x128xf32>
    %66 = vector.shape_cast %13 : vector<32x128xf32> to vector<4x8x128xf32>
    %cst_32 = arith.constant dense<0.000000e+00> : vector<8x128xf32>
    %67 = vector.multi_reduction <add>, %66, %cst_32 [0] : vector<4x8x128xf32> to vector<8x128xf32>
    %68 = arith.addf %65, %67 : vector<8x128xf32>
    %c3_33 = arith.constant 3 : index
    %c0_34 = arith.constant 0 : index
    %c0_35 = arith.constant 0 : index
    %69 = vector.load %arg5[%c3_33, %c0_34, %c0_35] : memref<4x8x128xf32, #tpu.memory_space<vmem>>, vector<1x8x128xf32>
    %70 = vector.shape_cast %69 : vector<1x8x128xf32> to vector<8x128xf32>
    %71 = vector.shape_cast %68 : vector<8x128xf32> to vector<1x8x128xf32>
    tpu.vector_store %arg5[%c3_33, %c0_34, %c0_35], %71 {strides = array<i32>} : memref<4x8x128xf32, #tpu.memory_space<vmem>>, vector<1x8x128xf32>,
    %c0_i32_36 = arith.constant 0 : i32
    %72 = arith.cmpi eq, %arg1, %c0_i32_36 : i32
    %73 = arith.extui %72 : i1 to i32
    %c0_i32_37 = arith.constant 0 : i32
    %74 = arith.cmpi ne, %73, %c0_i32_37 : i32
    scf.if %74 {
      %c0_38 = arith.constant 0 : index
      %c0_39 = arith.constant 0 : index
      %c0_40 = arith.constant 0 : index
      %75 = vector.load %arg5[%c0_38, %c0_39, %c0_40] : memref<4x8x128xf32, #tpu.memory_space<vmem>>, vector<4x8x128xf32>
      %c0_41 = arith.constant 0 : index
      %c0_42 = arith.constant 0 : index
      %c0_43 = arith.constant 0 : index
      %76 = vector.load %arg4[%c0_41, %c0_42, %c0_43] : memref<4x8x128xf32, #tpu.memory_space<vmem>>, vector<4x8x128xf32>
      tpu.vector_store %arg4[%c0_41, %c0_42, %c0_43], %75 {strides = array<i32>} : memref<4x8x128xf32, #tpu.memory_space<vmem>>, vector<4x8x128xf32>,
    } else {
    }
    return
  }
  func.func @transform_0(%arg0: i32, %arg1: i32) -> (i32, i32) {
    %c1_i32 = arith.constant 1 : i32
    %0 = arith.muli %arg0, %c1_i32 : i32
    %1 = arith.addi %0, %arg1 : i32
    %c0_i32 = arith.constant 0 : i32
    %c0_i32_0 = arith.constant 0 : i32
    return %1, %c0_i32 : i32, i32
  }
  func.func @transform_1(%arg0: i32, %arg1: i32) -> (i32, i32) {
    %c1_i32 = arith.constant 1 : i32
    %0 = arith.muli %arg0, %c1_i32 : i32
    %1 = arith.addi %0, %arg1 : i32
    %c0_i32 = arith.constant 0 : i32
    %c0_i32_0 = arith.constant 0 : i32
    return %1, %c0_i32 : i32, i32
  }
  func.func @transform_2(%arg0: i32, %arg1: i32) -> (i32, i32, i32) {
    %c0_i32 = arith.constant 0 : i32
    %c0_i32_0 = arith.constant 0 : i32
    %c0_i32_1 = arith.constant 0 : i32
    return %arg0, %c0_i32, %c0_i32_0 : i32, i32, i32
  }
}

</mosaic_0001>

<bundles_post_ra>
// kernel: auch_loss.2
= control target key start
LH: loop header
LB: loop body
LE: loop exit
PB: predicated region body
PF: predicated region fallthrough
CT: control target
= control target key end

     0   :  { %s443_s0 = inlined_call_operand.vmem [shape: f32[16], index: 0, kind: input, shape index: {}]   ;;  %s444_s1 = inlined_call_operand.<no memory space> [shape: f32[], index: 1, kind: input, shape index: {}]   ;;  %s445_s2 = inlined_call_operand.vmem [shape: s8[16], index: 2, kind: input, shape index: {}]   ;;  %s446_s3 = inlined_call_operand.<no memory space> [shape: s8[], index: 3, kind: input, shape index: {}]   ;;  %s447_s4 = inlined_call_operand.vmem [shape: f32[4,8,128], index: 4, kind: output, shape index: {}]  }
   0x1   :  { %v398_v0 = vstv %s444_s1  ;;  %v10_v1 = vstv %s446_s3 }
   0x2   :  { %v12_v2 = vshll.u32 %v10_v1, 24 }
   0x4   :  { %v13_v3 = vshra.s32 %v12_v2, 24 }
   0x5   :  { %v91_v4 = vld [vmem:[%s443_s0] sm:$0x1]  ;;  %v97_v5 = vlaneseq  ;;  %v208_v9 = vand.u32 2147483647, %v398_v0  ;;  %v224_v34 = vmax.f32 %v398_v0, 0.0  ;;  %v369_v36 = vmov 0.0  }
   0x6   :  { %v121_v6 = vld [vmem:[%s445_s2] ss:$0 sm:$0xf]  ;;  %v144_v7 = vpack.c.b16 0, %v13_v3  ;;  %vm260_vm10 = vcmp.ge.f32.partialorder %v398_v0, 0.0 }
   0x7   :  { %v122_v8 = vunpack.c.0.s8 %v121_v6  ;;  %vm100_vm0 = vcmp.lt.s32.totalorder %v97_v5, 16  ;;  %v212_v13 = vsub.f32 0.0, %v208_v9 }
   0x8   :  { %v145_v10 = vpack.c.b8 0, %v144_v7  ;;  %v411_v11 = vsel %vm100_vm0, %v91_v4, %v398_v0 }
   0x9   :  { %v135_v12 = vsel %vm100_vm0, %v122_v8, %v13_v3  ;;  %v207_v15 = vand.u32 2147483647, %v411_v11  ;;  %v217_v16 = vmul.f32 1.442695, %v212_v13  ;;  %v223_v33 = vmax.f32 %v411_v11, 0.0 }
   0xa   :  { %v138_v14 = vpack.c.b16 0, %v135_v12  ;;  %146 = vst [vmem:[#allocation14 + $0x2] sm:$0x3] %v145_v10  ;;  %vm259_vm9 = vcmp.ge.f32.partialorder %v411_v11, 0.0 }
   0xb   :  { %152 = vst [vmem:[#allocation14 + $0x4] sm:$0x3] %v145_v10  ;;  %v211_v18 = vsub.f32 0.0, %v207_v15  ;;  %357 = vpow2.f32 %v217_v16 }
   0xc   :  { %v139_v17 = vpack.c.b8 0, %v138_v14  ;;  %158 = vst [vmem:[#allocation14 + $0x6] sm:$0x3] %v145_v10 }
   0xd   :  { %v215_v19 = vmul.f32 1.442695, %v211_v18 }
   0xe   :  { %140 = vst [vmem:[#allocation14] sm:$0x3] %v139_v17 }
   0xf   :  { %359 = vpow2.f32 %v215_v19 }
  0x11   :  { %v414_v20 = vpop.eup %357 }
  0x12   :  { %v228_v22 = vadd.f32 1.0, %v414_v20 }
  0x14   :  { %361 = vlog2.f32 %v228_v22 }
  0x15   :  { %v348_v21 = vld [vmem:[#allocation14] sm:$0xff]   ;;  %v417_v23 = vpop.eup %359 }
  0x16   :  { %v349_v24 = vunpack.c.0.s8 %v348_v21  ;;  %v350_v25 = vunpack.c.1.s8 %v348_v21  ;;  %v353_v26 = vunpack.c.2.s8 %v348_v21  ;;  %v354_v27 = vunpack.c.3.s8 %v348_v21 }
  0x17   :  { %v227_v28 = vadd.f32 1.0, %v417_v23 }
  0x18   :  { %v179_v29 = vcvt.s32.f32 %v349_v24  ;;  %v180_v30 = vcvt.s32.f32 %v350_v25  ;;  %v181_v31 = vcvt.s32.f32 %v353_v26  ;;  %v182_v32 = vcvt.s32.f32 %v354_v27 }
  0x19   :  { %363 = vlog2.f32 %v227_v28 }
  0x1a   :  { %vm184_vm1 = vcmp.ge.f32.partialorder %v180_v30, 0.0  ;;  %vm185_vm2 = vcmp.ge.f32.partialorder %v181_v31, 0.0  ;;  %vm195_vm3 = vcmp.eq.f32.partialorder %v179_v29, 1.0  ;;  %vm196_vm4 = vcmp.eq.f32.partialorder %v180_v30, 1.0  ;;  %v362_v35 = vpop.eup %361 }
  0x1b   :  { %vm197_vm5 = vcmp.eq.f32.partialorder %v181_v31, 1.0  ;;  %vm183_vm6 = vcmp.ge.f32.partialorder %v179_v29, 0.0  ;;  %vm186_vm7 = vcmp.ge.f32.partialorder %v182_v32, 0.0  ;;  %v340_v37 = vsel %vm184_vm1, 1.0, %v369_v36 }
  0x1c   :  { %v344_v38 = vsel %vm196_vm4, 1.0, %v369_v36  ;;  %vm198_vm8 = vcmp.eq.f32.partialorder %v182_v32, 1.0  ;;  %v343_v39 = vsel %vm195_vm3, 1.0, %v369_v36  ;;  %v234_v40 = vmul.f32 0.6931472, %v362_v35 }
  0x1d   :  { %365 = vrcp.f32 %v227_v28  ;;  %v341_v42 = vsel %vm185_vm2, 1.0, %v369_v36  ;;  %v345_v43 = vsel %vm197_vm5, 1.0, %v369_v36  ;;  %v313_v44 = vadd.f32 %v344_v38, %v343_v39 }
  0x1e   :  { %367 = vrcp.f32 %v228_v22  ;;  %v339_v45 = vsel %vm183_vm6, 1.0, %v369_v36  ;;  %v240_v47 = vadd.f32 %v234_v40, %v224_v34  ;;  %v276_v48 = vmul.f32 %v344_v38, %v398_v0 }
  0x1f   :  { %v364_v41 = vpop.eup %363  ;;  %v342_v49 = vsel %vm186_vm7, 1.0, %v369_v36  ;;  %v346_v50 = vsel %vm198_vm8, 1.0, %v369_v36  ;;  %v275_v51 = vmul.f32 %v343_v39, %v411_v11  ;;  %v314_v52 = vadd.f32 %v345_v43, %v313_v44 }
  0x20   :  { %v232_v46 = vmul.f32 0.6931472, %v364_v41  ;;  %v272_v54 = vmul.f32 %v340_v37, %v240_v47  ;;  %v273_v55 = vmul.f32 %v341_v42, %v240_v47  ;;  %v277_v56 = vmul.f32 %v345_v43, %v398_v0 }
  0x21   :  { %v315_v57 = vadd.f32 %v346_v50, %v314_v52  ;;  %v274_v60 = vmul.f32 %v342_v49, %v240_v47  ;;  %v278_v61 = vmul.f32 %v346_v50, %v398_v0 }
  0x22   :  { %v239_v53 = vadd.f32 %v232_v46, %v223_v33  ;;  %v280_v62 = vsub.f32 %v272_v54, %v276_v48  ;;  %v281_v4 = vsub.f32 %v273_v55, %v277_v56 }
  0x23   :  { %v366_v58 = vpop.eup %365  ;;  %328 = vst [vmem:[%s447_s4 + $0x18] sm:$0xff] %v315_v57  ;;  %v282_v7 = vsub.f32 %v274_v60, %v278_v61 }
  0x24   :  { %v271_v59 = vmul.f32 %v339_v45, %v239_v53  ;;  %v368_v63 = vpop.eup %367  ;;  %v247_v1 = vmul.f32 %v366_v58, %v227_v28 }
  0x25   :  { %v248_v2 = vmul.f32 %v368_v63, %v228_v22 }
  0x26   :  { %v279_v3 = vsub.f32 %v271_v59, %v275_v51  ;;  %v251_v5 = vsub.f32 2.0, %v247_v1 }
  0x27   :  { %v252_v6 = vsub.f32 2.0, %v248_v2 }
  0x28   :  { %v284_v8 = vadd.f32 %v280_v62, %v279_v3  ;;  %v255_v9 = vmul.f32 %v366_v58, %v251_v5 }
  0x29   :  { %v256_v10 = vmul.f32 %v368_v63, %v252_v6 }
  0x2a   :  { %v285_v12 = vadd.f32 %v284_v8, %v281_v4  ;;  %v263_v13 = vmul.f32 %v417_v23, %v255_v9 }
  0x2b   :  { %v264_v14 = vmul.f32 %v414_v20, %v256_v10 }
  0x2c   :  { %v286_v15 = vadd.f32 %v285_v12, %v282_v7  ;;  %v267_v16 = vsel %vm259_vm9, %v255_v9, %v263_v13 }
  0x2d   :  { %v268_v17 = vsel %vm260_vm10, %v256_v10, %v264_v14  ;;  %v291_v18 = vmul.f32 %v339_v45, %v267_v16  ;;  %v302_v19 = vmul.f32 %v343_v39, %v267_v16 }
  0x2e   :  { %325 = vst [vmem:[%s447_s4] sm:$0xff] %v286_v15  ;;  %v292_v21 = vmul.f32 %v340_v37, %v268_v17  ;;  %v293_v22 = vmul.f32 %v341_v42, %v268_v17  ;;  %v303_v24 = vmul.f32 %v344_v38, %v268_v17  ;;  %v304_v11 = vmul.f32 %v345_v43, %v268_v17 }
  0x2f   :  { %v294_v25 = vmul.f32 %v342_v49, %v268_v17  ;;  %v305_v0 = vmul.f32 %v346_v50, %v268_v17 }
  0x30   :  { %v295_v26 = vadd.f32 %v292_v21, %v291_v18  ;;  %v306_v27 = vadd.f32 %v303_v24, %v302_v19 }
  0x32   :  { %v296_v23 = vadd.f32 %v295_v26, %v293_v22  ;;  %v307_v28 = vadd.f32 %v306_v27, %v304_v11 }
  0x34   :  { %v297_v20 = vadd.f32 %v296_v23, %v294_v25  ;;  %v308_v29 = vadd.f32 %v307_v28, %v305_v0 }
  0x36   :  { %326 = vst [vmem:[%s447_s4 + $0x8] sm:$0xff] %v297_v20 }
  0x37   :  { %327 = vst [vmem:[%s447_s4 + $0x10] sm:$0xff] %v308_v29 }

</bundles_post_ra>
